<compile_context>
chip_gen: v5e
topology: v5e:2x2
jax: 0.10.0
libtpu: 0.0.40
codegen_flags: <defaults>
</compile_context>

<pallas_src>
import functools

import jax
import jax.numpy as jnp
from jax.experimental import pallas as pl
from jax.experimental.pallas import tpu as pltpu


# ---------------------------------------------------------------------------
# Hardware queries (cached; conservative fallbacks if unavailable).
# ---------------------------------------------------------------------------
@functools.lru_cache(maxsize=None)
def _chip_kind():
    try:
        return jax.devices()[0].device_kind.lower()
    except Exception:
        return ""


@functools.lru_cache(maxsize=None)
def _vmem_capacity_bytes():
    try:
        cap = getattr(pltpu.get_tpu_info(), "vmem_capacity_bytes", None)
        if cap:
            return int(cap)
    except Exception:
        pass
    return 64 * 1024 * 1024          # smallest per-TC VMEM (v7x) -> always safe


@functools.lru_cache(maxsize=None)
def _num_tensorcores():
    try:
        info = pltpu.get_tpu_info()
        for attr in ("num_tensorcores", "tensorcores_per_chip", "num_cores",
                     "core_count"):
            v = getattr(info, attr, None)
            if isinstance(v, int) and v > 0:
                return v
    except Exception:
        pass
    return 2 if "v7" in _chip_kind() else 1


def _round_up(x, m):
    return ((x + m - 1) // m) * m


# ---------------------------------------------------------------------------
# Tile-size selection (generation aware).
# ---------------------------------------------------------------------------
def _pick_tm(m):
    cands = (128, 64, 32, 16, 8) if "v5" in _chip_kind() else (256, 128, 64, 32, 16, 8)
    for t in cands:
        if m % t == 0:
            return t
    return m                                   # full dim (exempt from 8x128 rule)


def _pick_tn(n):
    cands = (1024, 512, 256, 128)
    if _num_tensorcores() > 1:                 # v7x: keep both TCs busy along N
        for t in cands:
            if n % t == 0 and n // t >= 2:
                return t
    for t in cands:                            # single TC: just take the biggest tile
        if n % t == 0:
            return t
    return n


def _pick_tk(k):
    for t in (1024, 512, 256, 128):
        if k % t == 0:
            return t
    return k


# ---------------------------------------------------------------------------
# Fused whole-MLP kernel (all weights resident in VMEM, one launch).
# ---------------------------------------------------------------------------
def _fused_mlp_kernel(x_ref, *refs, n_layers):
    """refs = (w0, b0, w1, b1, ..., o_ref); weights bf16 (K,N), biases f32 (1,N)."""
    o_ref = refs[-1]
    h = x_ref[...]                                # bf16
    for i in range(n_layers):
        w = refs[2 * i][...]                      # bf16 (K_i, N_i)
        b = refs[2 * i + 1][...]                  # f32  (1,  N_i)
        y = jnp.dot(h.astype(jnp.bfloat16), w,
                    preferred_element_type=jnp.float32)
        y = y + b
        if i < n_layers - 1:                      # Tanh between all but last Linear.
            y = jnp.tanh(y)
        h = y
    o_ref[...] = h.astype(o_ref.dtype)


def _fused_budget_bytes():
    # Generation-aware fused budget: use v5e/v6e's 128 MiB, stay conservative on v7x.
    return (90 << 20) if _vmem_capacity_bytes() >= (100 << 20) else (24 << 20)


def _fused_vmem_limit_bytes():
    return (110 << 20) if _vmem_capacity_bytes() >= (100 << 20) else (40 << 20)


def _fused_vmem_bytes(M, prepared):
    """Data + per-layer temporaries (bf16 h copy, f32 dot output)."""
    total = M * prepared[0][0].shape[0] * 2          # x (bf16)
    for w_t, _ in prepared:
        k, n = w_t.shape
        total += k * n * 2                           # weight (bf16)
        total += n * 4                               # bias (f32)
        total += M * n * 4                           # f32 activation / dot output
        total += M * k * 2                           # bf16 copy of h before the dot
    return total


def _fused_mlp(x_bf16, prepared, out_features):
    M = x_bf16.shape[0]
    K0 = prepared[0][0].shape[0]
    N_last = prepared[-1][0].shape[1]
    flat = []
    for w_t, b in prepared:
        flat.extend((w_t, b))
    kernel = functools.partial(_fused_mlp_kernel, n_layers=len(prepared))
    limit = _fused_vmem_limit_bytes()

    tm = _pick_tm(M)
    if tm == M or M // tm < 2:
        # Small batch: grid-less single launch, everything VMEM resident.
        vmem_spec = pl.BlockSpec(memory_space=pltpu.MemorySpace.VMEM)
        out = pl.pallas_call(
            kernel,
            out_shape=jax.ShapeDtypeStruct((M, N_last), jnp.float32),
            in_specs=[vmem_spec] * (1 + len(flat)),
            out_specs=vmem_spec,
            compiler_params=pltpu.CompilerParams(vmem_limit_bytes=limit),
        )(x_bf16, *flat)
    else:
        # Larger batch: tile M ("parallel" -> both v7x TCs); weights/biases stay
        # resident via constant index_maps, only x/out tiles stream.
        ni = M // tm
        in_specs = [pl.BlockSpec((tm, K0), lambda i: (i, 0))]
        for w_t, b in prepared:
            in_specs.append(pl.BlockSpec(w_t.shape, lambda i: (0, 0)))
            in_specs.append(pl.BlockSpec(b.shape, lambda i: (0, 0)))
        out = pl.pallas_call(
            kernel,
            out_shape=jax.ShapeDtypeStruct((M, N_last), jnp.float32),
            grid_spec=pltpu.PrefetchScalarGridSpec(
                num_scalar_prefetch=0,
                grid=(ni,),
                in_specs=in_specs,
                out_specs=pl.BlockSpec((tm, N_last), lambda i: (i, 0)),
            ),
            compiler_params=pltpu.CompilerParams(
                dimension_semantics=("parallel",),
                vmem_limit_bytes=limit),
        )(x_bf16, *flat)

    return out[:, :out_features] if out_features != N_last else out


# ---------------------------------------------------------------------------
# Per-layer tiled fallback (weights too big for VMEM): y = act(x @ W_t + b).
# ---------------------------------------------------------------------------
def _linear_single_kernel(x_ref, w_ref, b_ref, o_ref, *, apply_tanh):
    """K fits one tile: single-shot, no accumulator."""
    y = jnp.dot(x_ref[...], w_ref[...], preferred_element_type=jnp.float32)
    y = y + b_ref[...]
    if apply_tanh:
        y = jnp.tanh(y)
    o_ref[...] = y.astype(o_ref.dtype)


def _linear_acc_kernel(x_ref, w_ref, b_ref, o_ref, acc_ref, *, apply_tanh):
    """K tiled: f32 scratch accumulator; first partial written directly at k==0."""
    k = pl.program_id(2)
    partial = jnp.dot(x_ref[...], w_ref[...], preferred_element_type=jnp.float32)

    @pl.when(k == 0)
    def _():
        acc_ref[...] = partial

    @pl.when(k > 0)
    def _():
        acc_ref[...] = acc_ref[...] + partial

    @pl.when(k == pl.num_programs(2) - 1)
    def _():
        y = acc_ref[...] + b_ref[...]
        if apply_tanh:
            y = jnp.tanh(y)
        o_ref[...] = y.astype(o_ref.dtype)


def _pallas_linear(x, w_t, b2, *, apply_tanh, out_dtype):
    """x:(M,K) bf16, w_t:(K,N) bf16 (pre-transposed), b2:(1,N) f32 -> (M,N) out_dtype."""
    M, K = x.shape
    K2, N = w_t.shape
    assert K == K2
    tm = _pick_tm(M)
    tn = _pick_tn(N)
    tk = _pick_tk(K)
    ni, nj, nk = M // tm, N // tn, K // tk

    # Explicit VMEM budget: double-buffered x / weight / bias / out tiles + acc.
    est = (2 * tm * tk * 2 + 2 * tk * tn * 2 + 2 * tn * 4
           + 2 * tm * tn * jnp.dtype(out_dtype).itemsize + tm * tn * 4)
    cap = _vmem_capacity_bytes()
    limit = int(min(cap - (8 << 20), max(32 << 20, 4 * est)))

    if nk == 1:
        kernel = functools.partial(_linear_single_kernel, apply_tanh=apply_tanh)
        grid = (ni, nj)
        in_specs = [
            pl.BlockSpec((tm, K), lambda i, j: (i, 0)),     # x row tile (bf16)
            pl.BlockSpec((K, tn), lambda i, j: (0, j)),     # weight tile (bf16 stream)
            pl.BlockSpec((1, tn), lambda i, j: (0, j)),     # bias tile (f32)
        ]
        out_specs = pl.BlockSpec((tm, tn), lambda i, j: (i, j))
        dims = ("parallel", "parallel")
        scratch = []
    else:
        kernel = functools.partial(_linear_acc_kernel, apply_tanh=apply_tanh)
        grid = (ni, nj, nk)                                  # reduction axis last
        in_specs = [
            pl.BlockSpec((tm, tk), lambda i, j, k: (i, k)),  # pipeline delivers K slice
            pl.BlockSpec((tk, tn), lambda i, j, k: (k, j)),
            pl.BlockSpec((1, tn), lambda i, j, k: (0, j)),
        ]
        out_specs = pl.BlockSpec((tm, tn), lambda i, j, k: (i, j))
        dims = ("parallel", "parallel", "arbitrary")
        scratch = [pltpu.VMEM((tm, tn), jnp.float32)]

    return pl.pallas_call(
        kernel,
        out_shape=jax.ShapeDtypeStruct((M, N), out_dtype),
        grid_spec=pltpu.PrefetchScalarGridSpec(
            num_scalar_prefetch=0,
            grid=grid,
            in_specs=in_specs,
            out_specs=out_specs,
            scratch_shapes=scratch,
        ),
        compiler_params=pltpu.CompilerParams(
            dimension_semantics=dims, vmem_limit_bytes=limit),
    )(x, w_t, b2)


# ---------------------------------------------------------------------------
# Parameters + forward
# ---------------------------------------------------------------------------
def init_mlp_params(key, sizes, dtype=jnp.float32):
    """Synthetic nn.Linear params: W (out, in), b (out,), uniform(+-1/sqrt(fan_in))."""
    params = []
    for i in range(len(sizes) - 1):
        key, kw, kb = jax.random.split(key, 3)
        bound = 1.0 / (sizes[i] ** 0.5)
        w = jax.random.uniform(kw, (sizes[i + 1], sizes[i]), dtype, -bound, bound)
        b = jax.random.uniform(kb, (sizes[i + 1],), dtype, -bound, bound)
        params.append((w, b))
    return params


def prepare_params(params):
    """Done ONCE: W -> (in, out) bf16, bias -> (1, out) f32, output columns padded
    to a multiple of 128 (lane-dense stores); returns (prepared, true_out_features)."""
    prepared = []
    prev_pad = None
    out_features = params[-1][0].shape[0]
    for w, b in params:
        n_out, n_in = w.shape
        w_t = w.T.astype(jnp.bfloat16)                        # (n_in, n_out)
        b2 = b.reshape(1, -1).astype(jnp.float32)             # (1, n_out)
        if prev_pad is not None and prev_pad != n_in:         # zero rows for padded K
            w_t = jnp.pad(w_t, ((0, prev_pad - n_in), (0, 0)))
        n_pad = _round_up(n_out, 128)                         # zero cols for lane-dense N
        if n_pad != n_out:
            w_t = jnp.pad(w_t, ((0, 0), (0, n_pad - n_out)))
            b2 = jnp.pad(b2, ((0, 0), (0, n_pad - n_out)))
        prepared.append((w_t, b2))
        prev_pad = n_pad
    return prepared, out_features


def mlp_forward(x, prep, *, force_per_layer=False):
    """Mirror of MLP.forward: Linear (+ Tanh on all but the last layer)."""
    prepared, out_features = prep
    h = x.astype(jnp.bfloat16)                                # cast ONCE in the wrapper
    if (not force_per_layer
            and _fused_vmem_bytes(x.shape[0], prepared) <= _fused_budget_bytes()):
        return _fused_mlp(h, prepared, out_features)
    n = len(prepared)
    for i, (w_t, b) in enumerate(prepared):
        last = (i == n - 1)
        h = _pallas_linear(h, w_t, b, apply_tanh=not last,
                           out_dtype=jnp.float32 if last else jnp.bfloat16)
    N_last = prepared[-1][0].shape[1]
    return h[:, :out_features] if out_features != N_last else h


def mlp_reference(x, params):
    """Pure-JAX reference (same bf16 weight / f32 accumulate recipe), unpadded params."""
    h = x
    n = len(params)
    for i, (w, b) in enumerate(params):
        h = jnp.dot(h.astype(jnp.bfloat16), w.T.astype(jnp.bfloat16),
                    preferred_element_type=jnp.float32) + b.astype(jnp.float32)
        if i < n - 1:
            h = jnp.tanh(h)
    return h


def _check(out, ref, tag):
    assert out.shape == ref.shape, (tag, out.shape, ref.shape)
    err = float(jnp.max(jnp.abs(out - ref)))
    assert jnp.allclose(out, ref, atol=2e-3, rtol=2e-3), f"{tag}: max abs err {err}"


if __name__ == "__main__":
    key = jax.random.PRNGKey(0)

    # 1) Small ClipCaption-style MLP, small batch -> fully fused grid-less path.
    sizes = (128, 256, 128)
    key, kp, kx = jax.random.split(key, 3)
    params = init_mlp_params(kp, sizes)
    prep = prepare_params(params)
    x = jax.random.normal(kx, (8, sizes[0]), jnp.float32)
    out = jax.block_until_ready(mlp_forward(x, prep))
    _check(out, mlp_reference(x, params), "fused-2layer")

    # 2) Deeper MLP (3 Linears, 2 Tanh) -> still fused.
    sizes2 = (128, 256, 256, 128)
    key, kp2, kx2 = jax.random.split(key, 3)
    params2 = init_mlp_params(kp2, sizes2)
    prep2 = prepare_params(params2)
    x2 = jax.random.normal(kx2, (8, sizes2[0]), jnp.float32)
    out2 = jax.block_until_ready(mlp_forward(x2, prep2))
    _check(out2, mlp_reference(x2, params2), "fused-3layer")

    # 3) Larger batch -> fused path with an M-tiled "parallel" grid.
    key, kx3 = jax.random.split(key)
    x3 = jax.random.normal(kx3, (512, sizes[0]), jnp.float32)
    out3 = jax.block_until_ready(mlp_forward(x3, prep))
    _check(out3, mlp_reference(x3, params), "fused-mtiled")

    # 4) Exercise the per-layer tiled fallback (big-weights regime) explicitly.
    sizes4 = (1024, 512, 256)
    key, kp4, kx4 = jax.random.split(key, 3)
    params4 = init_mlp_params(kp4, sizes4)
    prep4 = prepare_params(params4)
    x4 = jax.random.normal(kx4, (8, sizes4[0]), jnp.float32)
    out4 = jax.block_until_ready(mlp_forward(x4, prep4, force_per_layer=True))
    _check(out4, mlp_reference(x4, params4), "per-layer-tiled")

    # 5) Non-128-multiple widths -> padded lane-dense weights, sliced output.
    sizes5 = (192, 200, 96)
    key, kp5, kx5 = jax.random.split(key, 3)
    params5 = init_mlp_params(kp5, sizes5)
    prep5 = prepare_params(params5)
    x5 = jax.random.normal(kx5, (8, sizes5[0]), jnp.float32)
    out5 = jax.block_until_ready(mlp_forward(x5, prep5, force_per_layer=True))
    _check(out5, mlp_reference(x5, params5), "per-layer-padded")

    print("KERNEL_OK")
</pallas_src>

<mosaic_0001>
module attributes {stable_mosaic.version = 11 : i64} {
  func.func @_fused_mlp_kernel(%arg0: memref<8x128xbf16, #tpu.memory_space<vmem>>, %arg1: memref<128x256xbf16, #tpu.memory_space<vmem>>, %arg2: memref<1x256xf32, #tpu.memory_space<vmem>>, %arg3: memref<256x128xbf16, #tpu.memory_space<vmem>>, %arg4: memref<1x128xf32, #tpu.memory_space<vmem>>, %arg5: memref<8x128xf32, #tpu.memory_space<vmem>>) attributes {dimension_semantics = [], scalar_prefetch = 0 : i64, scratch_operands = 0 : i64, tpu.core_type = #tpu.core_type<tc>} {
    %c0 = arith.constant 0 : index
    %c0_0 = arith.constant 0 : index
    %0 = vector.load %arg0[%c0, %c0_0] : memref<8x128xbf16, #tpu.memory_space<vmem>>, vector<8x128xbf16>
    %c0_1 = arith.constant 0 : index
    %c0_2 = arith.constant 0 : index
    %1 = vector.load %arg1[%c0_1, %c0_2] : memref<128x256xbf16, #tpu.memory_space<vmem>>, vector<128x256xbf16>
    %c0_3 = arith.constant 0 : index
    %c0_4 = arith.constant 0 : index
    %2 = vector.load %arg2[%c0_3, %c0_4] : memref<1x256xf32, #tpu.memory_space<vmem>>, vector<1x256xf32>
    %cst = arith.constant dense<0.000000e+00> : vector<8x256xf32>
    %3 = tpu.matmul %0, %1, %cst {dimension_numbers = #tpu.dot_dimension_numbers<[1], [0], [0], [1], [0, 0, 1, 1], [], []>} : vector<8x128xbf16>, vector<128x256xbf16>, vector<8x256xf32> -> vector<8x256xf32>
    %4 = vector.broadcast %2 : vector<1x256xf32> to vector<8x256xf32>
    %5 = arith.addf %3, %4 : vector<8x256xf32>
    %6 = math.tanh %5 : vector<8x256xf32>
    %c0_5 = arith.constant 0 : index
    %c0_6 = arith.constant 0 : index
    %7 = vector.load %arg3[%c0_5, %c0_6] : memref<256x128xbf16, #tpu.memory_space<vmem>>, vector<256x128xbf16>
    %c0_7 = arith.constant 0 : index
    %c0_8 = arith.constant 0 : index
    %8 = vector.load %arg4[%c0_7, %c0_8] : memref<1x128xf32, #tpu.memory_space<vmem>>, vector<1x128xf32>
    %9 = arith.truncf %6 : vector<8x256xf32> to vector<8x256xbf16>
    %cst_9 = arith.constant dense<0.000000e+00> : vector<8x128xf32>
    %10 = tpu.matmul %9, %7, %cst_9 {dimension_numbers = #tpu.dot_dimension_numbers<[1], [0], [0], [1], [0, 0, 1, 1], [], []>} : vector<8x256xbf16>, vector<256x128xbf16>, vector<8x128xf32> -> vector<8x128xf32>
    %11 = vector.broadcast %8 : vector<1x128xf32> to vector<8x128xf32>
    %12 = arith.addf %10, %11 : vector<8x128xf32>
    %c0_10 = arith.constant 0 : index
    %c0_11 = arith.constant 0 : index
    %13 = vector.load %arg5[%c0_10, %c0_11] : memref<8x128xf32, #tpu.memory_space<vmem>>, vector<8x128xf32>
    tpu.vector_store %arg5[%c0_10, %c0_11], %12 {strides = array<i32>} : memref<8x128xf32, #tpu.memory_space<vmem>>, vector<8x128xf32>,
    return
  }
}

</mosaic_0001>

<bundles_post_ra>
// kernel: tpu_custom_call.1
= control target key start
LH: loop header
LB: loop body
LE: loop exit
PB: predicated region body
PF: predicated region fallthrough
CT: control target
= control target key end

     0   :  { %10 = vsyncpa [#allocation3], 0  ;;  %s750_s0 = inlined_call_operand.hbm [shape: bf16[8,128], index: 0, kind: input, shape index: {}]   ;;  %s751_s1 = inlined_call_operand.hbm [shape: bf16[128,256], index: 1, kind: input, shape index: {}]   ;;  %s752_s2 = inlined_call_operand.hbm [shape: f32[1,256], index: 2, kind: input, shape index: {}]   ;;  %s753_s3 = inlined_call_operand.hbm [shape: bf16[256,128], index: 3, kind: input, shape index: {}]   ;;  %s754_s4 = inlined_call_operand.vmem [shape: f32[1,128], index: 4, kind: input, shape index: {}]   ;;  %s755_s5 = inlined_call_operand.hbm [shape: f32[8,128], index: 5, kind: output, shape index: {}]  }
   0x1   :  { %11 = vsyncpa [#allocation6], 0 }
   0x2   :  { %12 = vsyncpa [#allocation9], 0  ;;  %s29_s20 = sshll.u32 %s751_s1, 4  ;;  %s30_s20 = int_to_ptr.hbm [resolvable:$true] %s29_s20 }
   0x3   :  { %13 = vsyncpa [#allocation4], 0  ;;  %s693_s21 = smov [#allocation5]   ;;  %s19_s25 = sshll.u32 %s750_s0, 4  ;;  %s20_s25 = int_to_ptr.hbm [resolvable:$true] %s19_s25 }
   0x4   :  { %s31_s22 = sshll.u32 %s693_s21, 4  ;;  %s694_s26 = smov 128   ;;  %s32_s22 = int_to_ptr.vmem [resolvable:$true] %s31_s22 }
   0x5   :  { %s695_s27 = smov 8   ;;  %s696_s28 = smov [#allocation2]  }
   0x6   :  { %37 = dma.hbm_to_vmem [thread:$0]  %s30_s20, 2048, %s32_s22, [#allocation6], %s694_s26, %s694_s26, %s695_s27  }
   0x7   :  { %s21_s29 = sshll.u32 %s696_s28, 4  ;;  %s43_s7 = sshll.u32 %s752_s2, 4  ;;  %s22_s29 = int_to_ptr.vmem [resolvable:$true] %s21_s29  ;;  %s44_s7 = int_to_ptr.hbm [resolvable:$true] %s43_s7 }
   0x8   :  { %24 = dma.hbm_to_vmem [thread:$0]  %s20_s25, 64, %s22_s29, [#allocation3]  }
   0x9   :  { %s53_s9 = sshll.u32 %s753_s3, 4  ;;  %s697_s10 = smov [#allocation7]   ;;  %s54_s9 = int_to_ptr.hbm [resolvable:$true] %s53_s9 }
   0xa   :  { %s45_s11 = sshll.u32 %s697_s10, 4  ;;  %s698_s0 = smov [#allocation8]   ;;  %s46_s11 = int_to_ptr.vmem [resolvable:$true] %s45_s11 }
   0xb   :  { %48 = dma.hbm_to_vmem [thread:$0]  %s44_s7, 32, %s46_s11, [#allocation6]  }
   0xc   :  { %s55_s12 = sshll.u32 %s698_s0, 4  ;;  %s699_s13 = smov 64   ;;  %s56_s12 = int_to_ptr.vmem [resolvable:$true] %s55_s12 }
   0xd   :  { %s700_s14 = smov 4  }
   0xe   :  { %61 = dma.hbm_to_vmem [thread:$0]  %s54_s9, 2048, %s56_s12, [#allocation9], %s699_s13, %s699_s13, %s700_s14  }
   0xf   :  { %685 = dma.done.wait [#allocation3], 64  }
  0x10   :  { %686 = vsyncadd [#allocation3], 4294967232 }
  0x11   :  { %687 = dma.done.wait [#allocation6], 2080  }
  0x12   :  { %688 = vsyncadd [#allocation6], 4294965216 }
  0x13   :  { %689 = dma.done.wait [#allocation9], 2048  }
  0x14   :  { %690 = vsyncadd [#allocation9], 4294965248  ;;  %v449_v0 = vld [vmem:[#allocation5 + $0x70] sm:$0xf]  ;;  %v534_v1 = vld [vmem:[#allocation5 + $0x74] sm:$0xf0] }
  0x15   :  { %v533_v2 = vld [vmem:[#allocation5 + $0x74] sm:$0xf]  ;;  %v450_v3 = vor.u32 %v534_v1, %v449_v0  ;;  %v451_v4 = vld [vmem:[#allocation5 + $0x78] sm:$0xf0]  ;;  %v441_v5 = vld [vmem:[#allocation5 + $0x60] sm:$0xf] }
  0x16   :  { %v532_v6 = vld [vmem:[#allocation5 + $0x64] sm:$0xf0]  ;;  %v454_v7 = vor.u32 %v533_v2, %v451_v4  ;;  %v531_v8 = vld [vmem:[#allocation5 + $0x64] sm:$0xf]  ;;  %v443_v9 = vld [vmem:[#allocation5 + $0x68] sm:$0xf0] }
  0x17   :  { %183 = vmatpush.bf16.msra.mxu0 %v450_v3  ;;  %v442_v10 = vor.u32 %v532_v6, %v441_v5  ;;  %v446_v11 = vor.u32 %v531_v8, %v443_v9  ;;  %v433_v12 = vld [vmem:[#allocation5 + $0x50] sm:$0xf]  ;;  %v530_v13 = vld [vmem:[#allocation5 + $0x54] sm:$0xf0]  ;;  %v529_v14 = vld [vmem:[#allocation5 + $0x54] sm:$0xf] }
  0x18   :  { %196 = vmatpush.bf16.msra.mxu1 %v454_v7  ;;  %v435_v15 = vld [vmem:[#allocation5 + $0x58] sm:$0xf0]  ;;  %v434_v16 = vor.u32 %v530_v13, %v433_v12  ;;  %v425_v18 = vld [vmem:[#allocation5 + $0x40] sm:$0xf]  ;;  %v528_v19 = vld [vmem:[#allocation5 + $0x44] sm:$0xf0] }
  0x19   :  { %v438_v17 = vor.u32 %v529_v14, %v435_v15  ;;  %v527_v20 = vld [vmem:[#allocation5 + $0x44] sm:$0xf]  ;;  %v427_v21 = vld [vmem:[#allocation5 + $0x48] sm:$0xf0]  ;;  %v426_v22 = vor.u32 %v528_v19, %v425_v18  ;;  %v542_v23 = vld [vmem:[#allocation8 + $0x38] sm:$0xff]  ;;  %s701_s15 = smov [#allocation10]  }
  0x1a   :  { %v550_v24 = vld [vmem:[#allocation8 + $0x78] sm:$0xff]  ;;  %v430_v25 = vor.u32 %v527_v20, %v427_v21  ;;  %v417_v26 = vld [vmem:[#allocation5 + $0x30] sm:$0xf]  ;;  %v525_v28 = vld [vmem:[#allocation5 + $0x34] sm:$0xf]  ;;  %345 = vmatpush.bf16.msra.mxu2 %v542_v23  ;;  %s377_s16 = sshll.u32 %s701_s15, 4  ;;  %s378_s16 = int_to_ptr.vmem [resolvable:$true] %s377_s16 }
  0x1b   :  { %184 = vmatpush.bf16.msra.mxu0 %v442_v10  ;;  %v526_v27 = vld [vmem:[#allocation5 + $0x34] sm:$0xf0]  ;;  %v419_v29 = vld [vmem:[#allocation5 + $0x38] sm:$0xf0]  ;;  %358 = vmatpush.bf16.msra.mxu3 %v550_v24  ;;  %v409_v34 = vld [vmem:[#allocation5 + $0x20] sm:$0xf] }
  0x1c   :  { %197 = vmatpush.bf16.msra.mxu1 %v446_v11  ;;  %v541_v30 = vld [vmem:[#allocation8 + $0x30] sm:$0xff]  ;;  %v418_v32 = vor.u32 %v526_v27, %v417_v26  ;;  %v422_v33 = vor.u32 %v525_v28, %v419_v29  ;;  %v524_v35 = vld [vmem:[#allocation5 + $0x24] sm:$0xf0]  ;;  %v523_v36 = vld [vmem:[#allocation5 + $0x24] sm:$0xf]  ;;  %s379_s19 = sshll.u32 %s755_s5, 4  ;;  %s380_s19 = int_to_ptr.hbm [resolvable:$true] %s379_s19 }
  0x1d   :  { %v549_v31 = vld [vmem:[#allocation8 + $0x70] sm:$0xff]  ;;  %v411_v37 = vld [vmem:[#allocation5 + $0x28] sm:$0xf0]  ;;  %v410_v40 = vor.u32 %v524_v35, %v409_v34  ;;  %v403_v45 = vld [vmem:[#allocation5 + $0x18] sm:$0xf0] }
  0x1e   :  { %346 = vmatpush.bf16.msra.mxu2 %v541_v30  ;;  %v540_v38 = vld [vmem:[#allocation8 + $0x28] sm:$0xff]  ;;  %v414_v41 = vor.u32 %v523_v36, %v411_v37  ;;  %v522_v43 = vld [vmem:[#allocation5 + $0x14] sm:$0xf0]  ;;  %v521_v44 = vld [vmem:[#allocation5 + $0x14] sm:$0xf] }
  0x1f   :  { %185 = vmatpush.bf16.msra.mxu0 %v434_v16  ;;  %359 = vmatpush.bf16.msra.mxu3 %v549_v31  ;;  %v548_v39 = vld [vmem:[#allocation8 + $0x68] sm:$0xff]  ;;  %v539_v46 = vld [vmem:[#allocation8 + $0x20] sm:$0xff]  ;;  %v406_v49 = vor.u32 %v521_v44, %v403_v45  ;;  %v538_v54 = vld [vmem:[#allocation8 + $0x18] sm:$0xff] }
  0x20   :  { %198 = vmatpush.bf16.msra.mxu1 %v438_v17  ;;  %v401_v42 = vld [vmem:[#allocation5 + $0x10] sm:$0xf]  ;;  %v547_v47 = vld [vmem:[#allocation8 + $0x60] sm:$0xff]  ;;  %v395_v53 = vld [vmem:[#allocation5 + $0x8] sm:$0xf0] }
  0x21   :  { %v402_v48 = vor.u32 %v522_v43, %v401_v42  ;;  %v393_v50 = vld [vmem:[#allocation5] sm:$0xf]  ;;  %v520_v51 = vld [vmem:[#allocation5 + $0x4] sm:$0xf0]  ;;  %v519_v52 = vld [vmem:[#allocation5 + $0x4] sm:$0xf] }
  0x22   :  { %347 = vmatpush.bf16.msra.mxu2 %v540_v38  ;;  %v546_v55 = vld [vmem:[#allocation8 + $0x58] sm:$0xff]  ;;  %v394_v56 = vor.u32 %v520_v51, %v393_v50  ;;  %v398_v57 = vor.u32 %v519_v52, %v395_v53  ;;  %v537_v59 = vld [vmem:[#allocation8 + $0x10] sm:$0xff]  ;;  %v536_v61 = vld [vmem:[#allocation8 + $0x8] sm:$0xff] }
  0x23   :  { %186 = vmatpush.bf16.msra.mxu0 %v426_v22  ;;  %360 = vmatpush.bf16.msra.mxu3 %v548_v39  ;;  %v80_v58 = vld [vmem:[#allocation2] sm:$0xf]  ;;  %v545_v60 = vld [vmem:[#allocation8 + $0x50] sm:$0xff]  ;;  %v544_v62 = vld [vmem:[#allocation8 + $0x48] sm:$0xff] }
  0x24   :  { %199 = vmatpush.bf16.msra.mxu1 %v430_v25  ;;  %v535_v63 = vld [vmem:[#allocation8] sm:$0xff]  ;;  %v97_v1 = vld [vmem:[#allocation7] sm:$0x3]  ;;  %v560_v14 = vld [vmem:[%s754_s4] ss:$0 sm:$0xff] }
  0x25   :  { %v543_v0 = vld [vmem:[#allocation8 + $0x40] sm:$0xff]  ;;  %v99_v2 = vperm.slane %v97_v1, 0  ;;  %v100_v3 = vperm.slane %v97_v1, 1 }
  0x26   :  { %348 = vmatpush.bf16.msra.mxu2 %v539_v46 }
  0x27   :  { %187 = vmatpush.bf16.msra.mxu0 %v418_v32  ;;  %361 = vmatpush.bf16.msra.mxu3 %v547_v47 }
  0x28   :  { %200 = vmatpush.bf16.msra.mxu1 %v422_v33 }
  0x2a   :  { %349 = vmatpush.bf16.msra.mxu2 %v538_v54 }
  0x2b   :  { %188 = vmatpush.bf16.msra.mxu0 %v410_v40  ;;  %362 = vmatpush.bf16.msra.mxu3 %v546_v55 }
  0x2c   :  { %201 = vmatpush.bf16.msra.mxu1 %v414_v41 }
  0x2e   :  { %350 = vmatpush.bf16.msra.mxu2 %v537_v59 }
  0x2f   :  { %189 = vmatpush.bf16.msra.mxu0 %v402_v48  ;;  %363 = vmatpush.bf16.msra.mxu3 %v545_v60 }
  0x30   :  { %202 = vmatpush.bf16.msra.mxu1 %v406_v49 }
  0x32   :  { %351 = vmatpush.bf16.msra.mxu2 %v536_v61 }
  0x33   :  { %190 = vmatpush.bf16.msra.mxu0 %v394_v56  ;;  %364 = vmatpush.bf16.msra.mxu3 %v544_v62 }
  0x34   :  { %203 = vmatpush.bf16.msra.mxu1 %v398_v57 }
  0x36   :  { %191 = vmatmul.bf16.vlgmr.msra.gmra.mxu0 %v80_v58  ;;  %352 = vmatpush.bf16.msra.mxu2 %v535_v63 }
  0x37   :  { %204 = vmatmul.bf16.vlgmr.msra.gmra.mxu1 %v80_v58  ;;  %365 = vmatpush.bf16.msra.mxu3 %v543_v0 }
  0xb3   :  { %v192_v4 = vpop.f32.mrf.mxu0 }
  0xb4   :  { %v193_v5 = vadd.f32 %v192_v4, %v99_v2  ;;  %v205_v6 = vpop.f32.mrf.mxu1 }
  0xb5   :  { %v206_v7 = vadd.f32 %v205_v6, %v100_v3 }
  0xb6   :  { %561 = vtanh.f32 %v193_v5 }
  0xb7   :  { %563 = vtanh.f32 %v206_v7 }
  0xbb   :  { %v194_v8 = vpop.f32.mrf.mxu0 }
  0xbc   :  { %v562_v9 = vpop.eup %561  ;;  %v207_v10 = vpop.f32.mrf.mxu1 }
  0xbd   :  { %v564_v11 = vpop.eup %563  ;;  %v244_v12 = vpack.c.bf16 %v562_v9, %v562_v9 }
  0xbe   :  { %v245_v13 = vpack.c.bf16 %v564_v11, %v564_v11 }
  0xbf   :  { %353 = vmatmul.bf16.vlgmr.msra.gmra.mxu2 %v244_v12 }
  0xc0   :  { %366 = vmatmul.bf16.vlgmr.msra.gmra.mxu3 %v245_v13 }
 0x142   :  { %v354_v15 = vpop.f32.mrf.mxu2 }
 0x143   :  { %v355_v16 = vadd.f32 %v560_v14, %v354_v15  ;;  %v367_v17 = vpop.f32.mrf.mxu3 }
 0x145   :  { %v368_v18 = vadd.f32 %v367_v17, %v355_v16 }
 0x147   :  { %371 = vst [vmem:[#allocation10] sm:$0xff] %v368_v18 }
 0x148   :  { %382 = dma.vmem_to_hbm [thread:$0]  %s378_s16, 128, %s380_s19, [#allocation4]  }
 0x14a   :  { %v356_v19 = vpop.f32.mrf.mxu2 }
 0x14b   :  { %v369_v20 = vpop.f32.mrf.mxu3 }
 0x14c   :  { %691 = dma.done.wait [#allocation4], 128  }
 0x14d   :  { %692 = vsyncadd [#allocation4], 4294967168 }
 0x14e   :  { %387 = vsyncpa [#allocation3], 1 }
 0x14f   :  { %388 = vsyncpa [#allocation6], 1 }
 0x150   :  { %389 = vsyncpa [#allocation9], 1 }
 0x151   :  { %390 = vsyncpa [#allocation4], 1 }

</bundles_post_ra>
